<compile_context>
chip_gen: v6e
topology: v6e:2x2x1
jax: 0.10.0
libtpu: 0.0.40
codegen_flags: <defaults>
</compile_context>

<pallas_src>
import numpy as np
import jax
import jax.numpy as jnp
from jax.experimental import pallas as pl
from jax.experimental.pallas import tpu as pltpu


# ---------------------------------------------------------------------------
# Helpers
# ---------------------------------------------------------------------------
def _round_up(x, m):
    return ((x + m - 1) // m) * m


def _vmem_budget_bytes():
    """~80% of this generation's physical VMEM (v5e/v6e: 128 MiB, v7x: 64 MiB)."""
    cap = 64 * 1024 * 1024
    try:
        info = pltpu.get_tpu_info()
        cap = int(getattr(info, "vmem_capacity_bytes", cap)) or cap
    except Exception:
        pass
    return int(cap * 0.8)


def _choose_tiles(B, Kp, Ep, w_bytes, x_bytes, out_bytes, budget):
    """Pick (tm, tk): batch tile and weight-K tile that fit the VMEM budget."""

    def usage(tm, tk):
        return (2 * tm * tk * x_bytes        # double-buffered activation tiles
                + 2 * tk * Ep * w_bytes      # double-buffered weight tiles
                + 2 * Ep * 4                 # bias
                + 2 * tm * Ep * out_bytes    # double-buffered output tiles
                + tm * Ep * 4)               # f32 accumulator scratch

    tm = min(256, _round_up(B, 16))
    # K tile: prefer the whole (padded) weight resident; otherwise stream it in the
    # largest multiple-of-128 chunks that divide Kp and still fit the budget.
    kb = Kp // 128
    cands = sorted({128 * d for d in range(1, kb + 1) if kb % d == 0}, reverse=True)
    tk = 128
    for cand in cands:
        if usage(tm, cand) <= budget:
            tk = cand
            break
    # Last resort: shrink the batch tile (floor 16), keep streaming the weight.
    while usage(tm, tk) > budget and tm > 16:
        tm = max(16, tm // 2)
    return tm, tk


# ---------------------------------------------------------------------------
# Kernels
# ---------------------------------------------------------------------------
def _epilogue(feats, b_ref, o_ref, no_imgnorm, use_abs):
    feats = feats + b_ref[...].astype(jnp.float32)
    if not no_imgnorm:
        # l2norm over dim=1: feats * rsqrt(sum(feats^2)); rsqrt runs on the EUP slot.
        # TODO(synk): no epsilon (matches the PyTorch reference); an all-zero feature
        # row produces NaN. Padded rows are sliced away by the wrapper.
        sq_sum = jnp.sum(feats * feats, axis=1, keepdims=True)
        feats = feats * jax.lax.rsqrt(sq_sum)
    if use_abs:
        feats = jnp.abs(feats)
    o_ref[...] = feats.astype(o_ref.dtype)


def _make_single_pass_kernel(no_imgnorm, use_abs, compute_dtype):
    def kernel(x_ref, w_ref, b_ref, o_ref):
        # x_ref: (TM, Kp)  activations (cast in-kernel)
        # w_ref: (Kp, Ep)  full padded weight, VMEM-resident
        # b_ref: (1, Ep)   bias (f32)
        feats = jnp.dot(x_ref[...].astype(compute_dtype), w_ref[...],
                        preferred_element_type=jnp.float32)
        _epilogue(feats, b_ref, o_ref, no_imgnorm, use_abs)
    return kernel


def _make_streaming_kernel(no_imgnorm, use_abs, compute_dtype):
    def kernel(x_ref, w_ref, b_ref, o_ref, acc_ref):
        # x_ref: (TM, tk) activation K-slab; w_ref: (tk, Ep) streamed weight tile.
        k = pl.program_id(1)

        @pl.when(k == 0)
        def _():
            acc_ref[...] = jnp.zeros_like(acc_ref)

        acc_ref[...] += jnp.dot(x_ref[...].astype(compute_dtype), w_ref[...],
                                preferred_element_type=jnp.float32)

        @pl.when(k == pl.num_programs(1) - 1)
        def _():
            _epilogue(acc_ref[...], b_ref, o_ref, no_imgnorm, use_abs)
    return kernel


# ---------------------------------------------------------------------------
# Module wrapper
# ---------------------------------------------------------------------------
class EncoderImage:
    """JAX/Pallas port of the PyTorch EncoderImage module (forward pass only)."""

    def __init__(self, img_dim, embed_size, use_abs=False, no_imgnorm=False, *,
                 key=None, compute_dtype=jnp.bfloat16, out_dtype=jnp.float32):
        # compute_dtype=bf16 is a documented deviation from the f32 PyTorch matmul
        # (inputs bf16, f32 MXU accumulation); use compute_dtype=jnp.float32 for
        # strict parity-sensitive use.
        # TODO(synk): optional fp8 (v7x) / int8 (v6e) weight quantization path not
        # implemented; only f32/bf16 weights supported here.
        self.img_dim = int(img_dim)
        self.embed_size = int(embed_size)
        self.use_abs = bool(use_abs)
        self.no_imgnorm = bool(no_imgnorm)
        self.compute_dtype = jnp.dtype(compute_dtype)
        self.out_dtype = jnp.dtype(out_dtype)
        self.Kp = _round_up(self.img_dim, 128)
        self.Ep = _round_up(self.embed_size, 128)
        if key is None:
            key = jax.random.PRNGKey(0)
        # Xavier-uniform init matching EncoderImage.init_weights (torch layout (E, K)).
        r = float(np.sqrt(6.0) / np.sqrt(self.img_dim + self.embed_size))
        w = jax.random.uniform(key, (self.embed_size, self.img_dim), jnp.float32, -r, r)
        self.load_weights(w, jnp.zeros((self.embed_size,), jnp.float32))

    # -- parameters ----------------------------------------------------------
    def load_weights(self, weight, bias):
        """weight: (embed_size, img_dim) [torch fc.weight layout]; bias: (embed_size,).

        The pad + cast happens here ONCE, not on every forward call.
        """
        E, K = self.embed_size, self.img_dim
        weight = jnp.asarray(weight, jnp.float32)
        bias = jnp.asarray(bias, jnp.float32)
        assert weight.shape == (E, K) and bias.shape == (E,)
        w_t = jnp.transpose(weight)                                         # (K, E)
        w_t = jnp.pad(w_t, ((0, self.Kp - K), (0, self.Ep - E)))
        self.w_pad = w_t.astype(self.compute_dtype)                         # (Kp, Ep)
        self.b_pad = jnp.pad(bias.reshape(1, E), ((0, 0), (0, self.Ep - E)))  # (1, Ep)
        # Keep unpadded f32 params for reference checks.
        self.weight = weight
        self.bias = bias

    # -- forward --------------------------------------------------------------
    def __call__(self, images, *, tm=None, tk=None):
        return self.forward(images, tm=tm, tk=tk)

    def forward(self, images, *, tm=None, tk=None):
        B, K = images.shape
        assert K == self.img_dim, f"expected img_dim={self.img_dim}, got {K}"
        Kp, Ep = self.Kp, self.Ep

        budget = _vmem_budget_bytes()
        x_bytes = 4
        w_bytes = self.compute_dtype.itemsize
        out_bytes = self.out_dtype.itemsize
        auto_tm, auto_tk = _choose_tiles(B, Kp, Ep, w_bytes, x_bytes, out_bytes, budget)
        tm = auto_tm if tm is None else int(tm)
        tk = auto_tk if tk is None else int(tk)
        assert tm % 16 == 0 and tk % 128 == 0 and Kp % tk == 0

        Bp = _round_up(B, tm)
        # Pad activations only when the shapes are not already tile-aligned.
        if (Bp, Kp) != (B, K):
            x = jnp.pad(images, ((0, Bp - B), (0, Kp - K)))
        else:
            x = images

        b_tiles = Bp // tm
        k_tiles = Kp // tk
        batch_sem = "parallel" if b_tiles >= 4 else "arbitrary"

        cost = pl.CostEstimate(
            flops=2 * Bp * Kp * Ep
                  + (0 if self.no_imgnorm else 3 * Bp * Ep)
                  + (Bp * Ep if self.use_abs else 0),
            transcendentals=0 if self.no_imgnorm else Bp,
            bytes_accessed=(Bp * Kp * x_bytes
                            + Kp * Ep * w_bytes * (b_tiles if k_tiles > 1 else 1)
                            + Ep * 4 + Bp * Ep * out_bytes))

        if k_tiles == 1:
            kernel = _make_single_pass_kernel(self.no_imgnorm, self.use_abs,
                                              self.compute_dtype)
            grid_spec = pltpu.PrefetchScalarGridSpec(
                num_scalar_prefetch=0,
                grid=(b_tiles,),
                in_specs=[pl.BlockSpec((tm, Kp), lambda i: (i, 0)),
                          pl.BlockSpec((Kp, Ep), lambda i: (0, 0)),
                          pl.BlockSpec((1, Ep), lambda i: (0, 0))],
                out_specs=pl.BlockSpec((tm, Ep), lambda i: (i, 0)))
            dim_sem = (batch_sem,)
        else:
            kernel = _make_streaming_kernel(self.no_imgnorm, self.use_abs,
                                            self.compute_dtype)
            grid_spec = pltpu.PrefetchScalarGridSpec(
                num_scalar_prefetch=0,
                grid=(b_tiles, k_tiles),
                in_specs=[pl.BlockSpec((tm, tk), lambda i, k: (i, k)),
                          pl.BlockSpec((tk, Ep), lambda i, k: (k, 0)),
                          pl.BlockSpec((1, Ep), lambda i, k: (0, 0))],
                out_specs=pl.BlockSpec((tm, Ep), lambda i, k: (i, 0)),
                scratch_shapes=[pltpu.VMEM((tm, Ep), jnp.float32)])
            dim_sem = (batch_sem, "arbitrary")

        out = pl.pallas_call(
            kernel,
            out_shape=jax.ShapeDtypeStruct((Bp, Ep), self.out_dtype),
            grid_spec=grid_spec,
            compiler_params=pltpu.CompilerParams(
                dimension_semantics=dim_sem,
                vmem_limit_bytes=budget),
            cost_estimate=cost,
        )(x, self.w_pad, self.b_pad)

        if (Bp, Ep) != (B, self.embed_size):
            out = out[:B, :self.embed_size]
        return out


# ---------------------------------------------------------------------------
# Reference
# ---------------------------------------------------------------------------
def reference_forward(images, weight, bias, *, no_imgnorm=False, use_abs=False):
    """Float64 numpy reference of Linear + l2norm (+abs). weight is (E, K)."""
    x = np.asarray(images, np.float64)
    w = np.asarray(weight, np.float64)
    b = np.asarray(bias, np.float64)
    f = x @ w.T + b
    if not no_imgnorm:
        f = f / np.sqrt((f * f).sum(axis=1, keepdims=True))
    if use_abs:
        f = np.abs(f)
    return f


# ---------------------------------------------------------------------------
# Test
# ---------------------------------------------------------------------------
if __name__ == "__main__":
    key = jax.random.PRNGKey(0)
    k_x1, k_w1, k_x2, k_w2, k_b = jax.random.split(key, 5)

    # ---- test 1: f32 parity path, ragged dims (lane padding + padded batch) ----
    B1, K1, E1 = 20, 96, 48
    enc1 = EncoderImage(K1, E1, key=k_w1, compute_dtype=jnp.float32)
    bias1 = 0.1 * jax.random.normal(k_b, (E1,), jnp.float32)   # exercise bias add
    enc1.load_weights(enc1.weight, bias1)
    images1 = jax.random.normal(k_x1, (B1, K1), jnp.float32)
    out1 = jax.block_until_ready(enc1(images1))
    np.testing.assert_allclose(
        np.asarray(out1, np.float64),
        reference_forward(images1, enc1.weight, enc1.bias),
        rtol=5e-3, atol=5e-3)

    # ---- test 2: bf16 MXU, streamed weight (K tiles), bf16 output, use_abs -----
    B2, K2, E2 = 40, 256, 128
    enc2 = EncoderImage(K2, E2, use_abs=True, key=k_w2,
                        compute_dtype=jnp.bfloat16, out_dtype=jnp.bfloat16)
    bias2 = 0.05 * jax.random.normal(jax.random.fold_in(k_b, 1), (E2,), jnp.float32)
    enc2.load_weights(enc2.weight, bias2)
    images2 = jax.random.normal(k_x2, (B2, K2), jnp.float32)
    # tm=16, tk=128 -> grid (3, 2): exercises the f32 accumulator + pl.when epilogue.
    out2 = jax.block_until_ready(enc2(images2, tm=16, tk=128))
    np.testing.assert_allclose(
        np.asarray(out2, np.float64),
        reference_forward(images2, enc2.weight, enc2.bias, use_abs=True),
        rtol=3e-2, atol=3e-2)

    print("KERNEL_OK")
</pallas_src>

<mosaic_0001>
module attributes {stable_mosaic.version = 11 : i64} {
  func.func @kernel(%arg0: i32, %arg1: memref<32x128xf32, #tpu.memory_space<vmem>>, %arg2: memref<128x128xf32, #tpu.memory_space<vmem>>, %arg3: memref<1x128xf32, #tpu.memory_space<vmem>>, %arg4: memref<32x128xf32, #tpu.memory_space<vmem>>) attributes {dimension_semantics = [#tpu.dimension_semantics<arbitrary>], iteration_bounds = array<i64: 1>, scalar_prefetch = 0 : i64, scratch_operands = 0 : i64, tpu.core_type = #tpu.core_type<tc>, window_params = [{transform_indices = @transform_0, window_bounds = array<i64: 32, 128>}, {pipeline_mode = #tpu.pipeline_mode<synchronous>, transform_indices = @transform_1, window_bounds = array<i64: 128, 128>}, {pipeline_mode = #tpu.pipeline_mode<synchronous>, transform_indices = @transform_2, window_bounds = array<i64: 1, 128>}, {transform_indices = @transform_3, window_bounds = array<i64: 32, 128>}]} {
    %c0 = arith.constant 0 : index
    %c0_0 = arith.constant 0 : index
    %0 = vector.load %arg1[%c0, %c0_0] : memref<32x128xf32, #tpu.memory_space<vmem>>, vector<32x128xf32>
    %c0_1 = arith.constant 0 : index
    %c0_2 = arith.constant 0 : index
    %1 = vector.load %arg2[%c0_1, %c0_2] : memref<128x128xf32, #tpu.memory_space<vmem>>, vector<128x128xf32>
    %cst = arith.constant dense<0.000000e+00> : vector<32x128xf32>
    %2 = tpu.matmul %0, %1, %cst {dimension_numbers = #tpu.dot_dimension_numbers<[1], [0], [0], [1], [0, 0, 1, 1], [], []>} : vector<32x128xf32>, vector<128x128xf32>, vector<32x128xf32> -> vector<32x128xf32>
    %c0_3 = arith.constant 0 : index
    %c0_4 = arith.constant 0 : index
    %3 = vector.load %arg3[%c0_3, %c0_4] : memref<1x128xf32, #tpu.memory_space<vmem>>, vector<1x128xf32>
    %4 = vector.broadcast %3 : vector<1x128xf32> to vector<32x128xf32>
    %5 = arith.addf %2, %4 : vector<32x128xf32>
    %6 = arith.mulf %5, %5 : vector<32x128xf32>
    %cst_5 = arith.constant dense<0.000000e+00> : vector<32xf32>
    %7 = vector.multi_reduction <add>, %6, %cst_5 [1] : vector<32x128xf32> to vector<32xf32>
    %8 = vector.shape_cast %7 : vector<32xf32> to vector<32x1xf32>
    %9 = math.rsqrt %8 : vector<32x1xf32>
    %10 = vector.broadcast %9 : vector<32x1xf32> to vector<32x128xf32>
    %11 = arith.mulf %5, %10 : vector<32x128xf32>
    %c0_6 = arith.constant 0 : index
    %c0_7 = arith.constant 0 : index
    %12 = vector.load %arg4[%c0_6, %c0_7] : memref<32x128xf32, #tpu.memory_space<vmem>>, vector<32x128xf32>
    tpu.vector_store %arg4[%c0_6, %c0_7], %11 {strides = array<i32>} : memref<32x128xf32, #tpu.memory_space<vmem>>, vector<32x128xf32>,
    return
  }
  func.func @transform_0(%arg0: i32) -> (i32, i32) {
    %c0_i32 = arith.constant 0 : i32
    %c0_i32_0 = arith.constant 0 : i32
    return %arg0, %c0_i32 : i32, i32
  }
  func.func @transform_1(%arg0: i32) -> (i32, i32) {
    %c0_i32 = arith.constant 0 : i32
    %c0_i32_0 = arith.constant 0 : i32
    %c0_i32_1 = arith.constant 0 : i32
    return %c0_i32, %c0_i32_0 : i32, i32
  }
  func.func @transform_2(%arg0: i32) -> (i32, i32) {
    %c0_i32 = arith.constant 0 : i32
    %c0_i32_0 = arith.constant 0 : i32
    %c0_i32_1 = arith.constant 0 : i32
    return %c0_i32, %c0_i32_0 : i32, i32
  }
  func.func @transform_3(%arg0: i32) -> (i32, i32) {
    %c0_i32 = arith.constant 0 : i32
    %c0_i32_0 = arith.constant 0 : i32
    return %arg0, %c0_i32 : i32, i32
  }
}

</mosaic_0001>

<bundles_post_ra>
// kernel: tpu_custom_call.1
= control target key start
LH: loop header
LB: loop body
LE: loop exit
PB: predicated region body
PF: predicated region fallthrough
CT: control target
= control target key end

     0   :  { %8 = vsyncpa [#allocation3], 0  ;;  %s413_s0 = inlined_call_operand.hbm [shape: f32[32,128], index: 0, kind: input, shape index: {}]   ;;  %s414_s1 = inlined_call_operand.hbm [shape: f32[128,128], index: 1, kind: input, shape index: {}]   ;;  %s415_s2 = inlined_call_operand.vmem [shape: f32[1,128], index: 2, kind: input, shape index: {}]   ;;  %s416_s3 = inlined_call_operand.hbm [shape: f32[32,128], index: 3, kind: output, shape index: {}]  }
   0x1   :  { %9 = vsyncpa [#allocation6], 0 }
   0x2   :  { %10 = vsyncpa [#allocation4], 0  ;;  %s367_s12 = smov [#allocation2]  }
   0x3   :  { %s16_s13 = sshll.u32 %s367_s12, 4  ;;  %s17_s13 = int_to_ptr.vmem [resolvable:$true] %s16_s13 }
   0x4   :  { %s309_s14 = scalar_lea.vmem %s17_s13, 512  ;;  %p314_p1 = scmp.lt.s32.totalorder %s17_s13, %s17_s13 }
   0x5   :  { %p310_p0 = scmp.ne.s32.totalorder %s17_s13, %s309_s14  ;;  %p315_p2 = scmp.lt.s32.totalorder %s309_s14, %s309_s14 }
   0x7   :  { %p316_p3 = por %p315_p2, %p314_p1 }
   0x9   :  { %p317_p4 = pnand %p316_p3, %p310_p0 }
   0xb   :  { %320 = shalt.err (!%p317_p4)
}
   0xc   :  { %s368_s15 = smov 128   ;;  %s369_s16 = smov 8  }
   0xd   :  { %22 = dma.hbm_to_vmem [thread:$0]  %s413_s0, 512, %s17_s13, [#allocation3], %s368_s15, %s368_s15, %s369_s16  }
   0xe   :  { %s370_s19 = smov [#allocation5]  }
   0xf   :  { %s28_s20 = sshll.u32 %s370_s19, 4  ;;  %s29_s20 = int_to_ptr.vmem [resolvable:$true] %s28_s20 }
  0x10   :  { %s329_s21 = scalar_lea.vmem %s29_s20, 2048  ;;  %p334_p6 = scmp.lt.s32.totalorder %s29_s20, %s29_s20 }
  0x11   :  { %p330_p5 = scmp.ne.s32.totalorder %s29_s20, %s329_s21  ;;  %p335_p7 = scmp.lt.s32.totalorder %s329_s21, %s329_s21 }
  0x13   :  { %p336_p8 = por %p335_p7, %p334_p6 }
  0x15   :  { %p337_p9 = pnand %p336_p8, %p330_p5 }
  0x17   :  { %340 = shalt.err (!%p337_p9)
}
  0x18   :  { %34 = dma.hbm_to_vmem [thread:$0]  %s414_s1, 2048, %s29_s20, [#allocation6], %s368_s15, %s368_s15, %s369_s16  }
  0x19   :  { %361 = dma.done.wait [#allocation3], 512  }
  0x1a   :  { %362 = vsyncadd [#allocation3], 4294966784 }
  0x1b   :  { %363 = dma.done.wait [#allocation6], 2048  }
  0x1c   :  { %364 = vsyncadd [#allocation6], 4294965248  ;;  %v62_v0 = vld [vmem:[#allocation5 + $0x78] sm:$0xff]  ;;  %v61_v1 = vld [vmem:[#allocation5 + $0x70] sm:$0xff] }
  0x1d   :  { %218 = vmatprep.subr.mxu0 %v62_v0  ;;  %256 = vmatprep.subr.mxu1 %v62_v0  ;;  %v60_v2 = vld [vmem:[#allocation5 + $0x68] sm:$0xff]  ;;  %v59_v3 = vld [vmem:[#allocation5 + $0x60] sm:$0xff]  ;;  %v58_v4 = vld [vmem:[#allocation5 + $0x58] sm:$0xff] }
  0x1e   :  { %219 = vmatpush3.msra.mxu0 %v62_v0  ;;  %272 = vmatpush3.msra.mxu1 %v62_v0  ;;  %v57_v5 = vld [vmem:[#allocation5 + $0x50] sm:$0xff]  ;;  %v56_v6 = vld [vmem:[#allocation5 + $0x48] sm:$0xff]  ;;  %v55_v7 = vld [vmem:[#allocation5 + $0x40] sm:$0xff] }
  0x1f   :  { %220 = vmatprep.subr.mxu0 %v61_v1  ;;  %257 = vmatprep.subr.mxu1 %v61_v1  ;;  %v54_v8 = vld [vmem:[#allocation5 + $0x38] sm:$0xff]  ;;  %v53_v9 = vld [vmem:[#allocation5 + $0x30] sm:$0xff]  ;;  %v52_v10 = vld [vmem:[#allocation5 + $0x28] sm:$0xff] }
  0x20   :  { %221 = vmatpush3.msra.mxu0 %v61_v1  ;;  %273 = vmatpush3.msra.mxu1 %v61_v1  ;;  %v51_v11 = vld [vmem:[#allocation5 + $0x20] sm:$0xff]  ;;  %v50_v12 = vld [vmem:[#allocation5 + $0x18] sm:$0xff]  ;;  %v49_v13 = vld [vmem:[#allocation5 + $0x10] sm:$0xff] }
  0x21   :  { %222 = vmatprep.subr.mxu0 %v60_v2  ;;  %258 = vmatprep.subr.mxu1 %v60_v2  ;;  %v48_v14 = vld [vmem:[#allocation5 + $0x8] sm:$0xff]  ;;  %v47_v15 = vld [vmem:[#allocation5] sm:$0xff]  ;;  %v45_v17 = vld [vmem:[#allocation2 + $0x10] sm:$0xff] }
  0x22   :  { %223 = vmatpush3.msra.mxu0 %v60_v2  ;;  %274 = vmatpush3.msra.mxu1 %v60_v2  ;;  %v43_v16 = vld [vmem:[#allocation2] sm:$0xff]  ;;  %v44_v18 = vld [vmem:[#allocation2 + $0x8] sm:$0xff]  ;;  %v46_v19 = vld [vmem:[#allocation2 + $0x18] sm:$0xff] }
  0x23   :  { %224 = vmatprep.subr.mxu0 %v59_v3  ;;  %259 = vmatprep.subr.mxu1 %v59_v3  ;;  %v197_v22 = vld [vmem:[%s415_s2] ss:$0 sm:$0xff]  ;;  %s371_s2 = smov [#allocation7]  }
  0x24   :  { %225 = vmatpush3.msra.mxu0 %v59_v3  ;;  %275 = vmatpush3.msra.mxu1 %v59_v3  ;;  %s184_s24 = sshll.u32 %s371_s2, 4  ;;  %s185_s24 = int_to_ptr.vmem [resolvable:$true] %s184_s24 }
  0x25   :  { %226 = vmatprep.subr.mxu0 %v58_v4  ;;  %260 = vmatprep.subr.mxu1 %v58_v4  ;;  %s341_s25 = scalar_lea.vmem %s185_s24, 512  ;;  %p346_p11 = scmp.lt.s32.totalorder %s185_s24, %s185_s24 }
  0x26   :  { %227 = vmatpush3.msra.mxu0 %v58_v4  ;;  %276 = vmatpush3.msra.mxu1 %v58_v4  ;;  %p342_p10 = scmp.ne.s32.totalorder %s185_s24, %s341_s25  ;;  %p347_p12 = scmp.lt.s32.totalorder %s341_s25, %s341_s25 }
  0x27   :  { %228 = vmatprep.subr.mxu0 %v57_v5  ;;  %261 = vmatprep.subr.mxu1 %v57_v5 }
  0x28   :  { %229 = vmatpush3.msra.mxu0 %v57_v5  ;;  %277 = vmatpush3.msra.mxu1 %v57_v5  ;;  %p348_p13 = por %p347_p12, %p346_p11 }
  0x29   :  { %230 = vmatprep.subr.mxu0 %v56_v6  ;;  %262 = vmatprep.subr.mxu1 %v56_v6 }
  0x2a   :  { %231 = vmatpush3.msra.mxu0 %v56_v6  ;;  %278 = vmatpush3.msra.mxu1 %v56_v6  ;;  %p349_p0 = pnand %p348_p13, %p342_p10 }
  0x2b   :  { %232 = vmatprep.subr.mxu0 %v55_v7  ;;  %263 = vmatprep.subr.mxu1 %v55_v7 }
  0x2c   :  { %233 = vmatpush3.msra.mxu0 %v55_v7  ;;  %279 = vmatpush3.msra.mxu1 %v55_v7 }
  0x2d   :  { %234 = vmatprep.subr.mxu0 %v54_v8  ;;  %264 = vmatprep.subr.mxu1 %v54_v8 }
  0x2e   :  { %235 = vmatpush3.msra.mxu0 %v54_v8  ;;  %280 = vmatpush3.msra.mxu1 %v54_v8 }
  0x2f   :  { %236 = vmatprep.subr.mxu0 %v53_v9  ;;  %265 = vmatprep.subr.mxu1 %v53_v9 }
  0x30   :  { %237 = vmatpush3.msra.mxu0 %v53_v9  ;;  %281 = vmatpush3.msra.mxu1 %v53_v9 }
  0x31   :  { %238 = vmatprep.subr.mxu0 %v52_v10  ;;  %266 = vmatprep.subr.mxu1 %v52_v10 }
  0x32   :  { %239 = vmatpush3.msra.mxu0 %v52_v10  ;;  %282 = vmatpush3.msra.mxu1 %v52_v10 }
  0x33   :  { %240 = vmatprep.subr.mxu0 %v51_v11  ;;  %267 = vmatprep.subr.mxu1 %v51_v11 }
  0x34   :  { %241 = vmatpush3.msra.mxu0 %v51_v11  ;;  %283 = vmatpush3.msra.mxu1 %v51_v11 }
  0x35   :  { %242 = vmatprep.subr.mxu0 %v50_v12  ;;  %268 = vmatprep.subr.mxu1 %v50_v12 }
  0x36   :  { %243 = vmatpush3.msra.mxu0 %v50_v12  ;;  %284 = vmatpush3.msra.mxu1 %v50_v12 }
  0x37   :  { %244 = vmatprep.subr.mxu0 %v49_v13  ;;  %269 = vmatprep.subr.mxu1 %v49_v13 }
  0x38   :  { %245 = vmatpush3.msra.mxu0 %v49_v13  ;;  %285 = vmatpush3.msra.mxu1 %v49_v13 }
  0x39   :  { %246 = vmatprep.subr.mxu0 %v48_v14  ;;  %270 = vmatprep.subr.mxu1 %v48_v14 }
  0x3a   :  { %247 = vmatpush3.msra.mxu0 %v48_v14  ;;  %286 = vmatpush3.msra.mxu1 %v48_v14 }
  0x3b   :  { %248 = vmatprep.subr.mxu0 %v47_v15  ;;  %271 = vmatprep.subr.mxu1 %v47_v15 }
  0x3c   :  { %249 = vmatpush3.msra.mxu0 %v47_v15  ;;  %287 = vmatpush3.msra.mxu1 %v47_v15 }
  0x3d   :  { %250 = vmatprep.mubr.f32.mxu0 %v43_v16  ;;  %253 = vmatprep.mubr.f32.mxu1 %v45_v17 }
  0x3e   :  { %251 = vmatmul.mubr.f32.vlgmr.msra.gmra.mxu0 %v44_v18  ;;  %254 = vmatmul.mubr.f32.vlgmr.msra.gmra.mxu1 %v46_v19 }
  0xfe   :  { %v252_v20 = vpop.f32.mrf.mxu0  ;;  %v255_v21 = vpop.f32.mrf.mxu1 }
  0xff   :  { %v142_v27 = vadd.f32 %v252_v20, %v197_v22  ;;  %v152_v28 = vadd.f32 %v255_v21, %v197_v22 }
 0x100   :  { %v136_v23 = vpop.f32.mrf.mxu0  ;;  %v146_v24 = vpop.f32.mrf.mxu1 }
 0x101   :  { %v137_v25 = vadd.f32 %v197_v22, %v136_v23  ;;  %v147_v26 = vadd.f32 %v197_v22, %v146_v24  ;;  %v158_v31 = vmul.f32 %v152_v28, %v152_v28  ;;  %v156_v32 = vmul.f32 %v142_v27, %v142_v27 }
 0x103   :  { %v157_v29 = vmul.f32 %v147_v26, %v147_v26  ;;  %v155_v30 = vmul.f32 %v137_v25, %v137_v25 }
 0x105   :  { %163 = vadd.xlane.f32.xlu1 %v157_v29  ;;  %159 = vadd.xlane.f32.xlu0 %v155_v30 }
 0x109   :  { %165 = vadd.xlane.f32.xlu1 %v158_v31  ;;  %161 = vadd.xlane.f32.xlu0 %v156_v32 }
 0x18e   :  { %v164_v33 = vpop.xlane.xlu1 %163  ;;  %v160_v34 = vpop.xlane.xlu0 %159 }
 0x18f   :  { %293 = vrsqrt.f32 %v164_v33 }
 0x190   :  { %295 = vrsqrt.f32 %v160_v34 }
 0x192   :  { %v166_v35 = vpop.xlane.xlu1 %165  ;;  %v162_v36 = vpop.xlane.xlu0 %161 }
 0x193   :  { %297 = vrsqrt.f32 %v166_v35 }
 0x194   :  { %299 = vrsqrt.f32 %v162_v36 }
 0x19c   :  { %v294_v37 = vpop.eup %293 }
 0x19d   :  { %v296_v38 = vpop.eup %295  ;;  %v173_v39 = vmul.f32 %v294_v37, %v147_v26 }
 0x19e   :  { %v171_v40 = vmul.f32 %v296_v38, %v137_v25 }
 0x19f   :  { %177 = vst [vmem:[#allocation7 + $0x10] sm:$0xff] %v173_v39 }
 0x1a0   :  { %v298_v41 = vpop.eup %297  ;;  %175 = vst [vmem:[#allocation7] sm:$0xff] %v171_v40 }
 0x1a1   :  { %v300_v42 = vpop.eup %299  ;;  %v174_v43 = vmul.f32 %v298_v41, %v152_v28 }
 0x1a2   :  { %v172_v44 = vmul.f32 %v300_v42, %v142_v27 }
 0x1a3   :  { %178 = vst [vmem:[#allocation7 + $0x18] sm:$0xff] %v174_v43 }
 0x1a4   :  { %176 = vst [vmem:[#allocation7 + $0x8] sm:$0xff] %v172_v44 }
 0x1a5   :  { %352 = shalt.err (!%p349_p0)
}
 0x1a6   :  { %190 = dma.vmem_to_hbm [thread:$0]  %s185_s24, 512, %s416_s3, [#allocation4], %s368_s15, %s368_s15, %s369_s16  }
 0x1a7   :  { %365 = dma.done.wait [#allocation4], 512  }
 0x1a8   :  { %366 = vsyncadd [#allocation4], 4294966784 }
 0x1a9   :  { %194 = vsyncpa [#allocation3], 1 }
 0x1aa   :  { %195 = vsyncpa [#allocation6], 1 }
 0x1ab   :  { %196 = vsyncpa [#allocation4], 1 }

</bundles_post_ra>
